<compile_context>
chip_gen: v7x
topology: tpu7x:2x2x1
jax: 0.10.0
libtpu: 0.0.40
codegen_flags: <defaults>
</compile_context>

<pallas_src>
import jax
import jax.numpy as jnp
from jax.experimental import pallas as pl
from jax.experimental.pallas import tpu as pltpu

C_PAD = 128      # lane-dense output width; real classes live in [:, :n_classes]
NEG_BIG = -1e30  # bias padding -> padded logits exp() to exactly 0


def dcd_kernel(x_ref, w1_ref, b1_ref, w2_ref, b2_ref, w3_ref, b3_ref, o_ref):
    x = x_ref[...]                                                    # (TB, IN) bf16
    # fc1 + relu (bf16 MXU, f32 accumulate)
    h1 = jnp.dot(x, w1_ref[...], preferred_element_type=jnp.float32) + b1_ref[...]
    h1 = jnp.maximum(h1, 0.0).astype(jnp.bfloat16)
    # fc2 (no activation, matches reference)
    h2 = jnp.dot(h1, w2_ref[...], preferred_element_type=jnp.float32) + b2_ref[...]
    h2 = h2.astype(jnp.bfloat16)
    # fc3, lane-padded to 128 classes (padded lanes have a -1e30 bias)
    logits = jnp.dot(h2, w3_ref[...], preferred_element_type=jnp.float32) + b3_ref[...]
    # softmax over dim=1 (class dim), max-stabilized, in f32
    m = jnp.max(logits, axis=1, keepdims=True)
    e = jnp.exp(logits - m)                       # padded lanes underflow to 0
    denom = jnp.sum(e, axis=1, keepdims=True)
    o_ref[...] = (e * pl.reciprocal(denom, approx=True)).astype(o_ref.dtype)


def _round_up(v, m):
    return (v + m - 1) // m * m


def dcd_forward(x, w1, b1, w2, b2, w3, b3, *, tb=None):
    """x: (B, input_features) f32. w*: (in, out) f32. b*: (1, out) f32.
    Returns softmax probabilities of shape (B, n_classes) in f32."""
    B, IN = x.shape
    H = w1.shape[1]
    C = w3.shape[1]

    # Batch tile: as large as useful (cap 1024), >= 2 grid steps when the batch
    # allows it (v7x dual-TC sharding via "parallel"), multiple of 16 for bf16
    # sublane packing. Double-buffered bf16 x tile at tb=1024 is ~0.5 MiB: fits
    # comfortably inside even v7x's 32 MiB scoped-VMEM default.
    if tb is None:
        tb = min(1024, _round_up(max(pl.cdiv(B, 2), 16), 16))
    assert tb % 16 == 0, "batch tile must be a multiple of 16 (bf16 sublane packing)"

    B_pad = _round_up(B, tb)
    if B_pad != B:
        x = jnp.pad(x, ((0, B_pad - B), (0, 0)))

    # bf16 inputs/weights: halves HBM traffic on the dominant x load; f32 accumulate.
    x_bf = x.astype(jnp.bfloat16)
    w1_bf = w1.astype(jnp.bfloat16)
    w2_bf = w2.astype(jnp.bfloat16)

    # Pad fc3 to a lane-dense 128-wide output. Padded weight columns are zero and
    # padded bias lanes are -1e30, so those logits never affect the softmax.
    w3_p = jnp.zeros((H, C_PAD), jnp.bfloat16).at[:, :C].set(w3.astype(jnp.bfloat16))
    b3_p = jnp.full((1, C_PAD), NEG_BIG, jnp.float32).at[:, :C].set(b3.astype(jnp.float32))

    grid = (B_pad // tb,)
    out = pl.pallas_call(
        dcd_kernel,
        out_shape=jax.ShapeDtypeStruct((B_pad, C_PAD), jnp.float32),
        grid_spec=pltpu.PrefetchScalarGridSpec(
            num_scalar_prefetch=0,
            grid=grid,
            in_specs=[
                pl.BlockSpec((tb, IN), lambda i: (i, 0)),     # x tile (streamed)
                pl.BlockSpec((IN, H), lambda i: (0, 0)),      # W1 (VMEM-resident)
                pl.BlockSpec((1, H), lambda i: (0, 0)),       # b1
                pl.BlockSpec((H, H), lambda i: (0, 0)),       # W2
                pl.BlockSpec((1, H), lambda i: (0, 0)),       # b2
                pl.BlockSpec((H, C_PAD), lambda i: (0, 0)),   # W3 (lane-padded)
                pl.BlockSpec((1, C_PAD), lambda i: (0, 0)),   # b3 (lane-padded)
            ],
            out_specs=pl.BlockSpec((tb, C_PAD), lambda i: (i, 0)),
        ),
        compiler_params=pltpu.CompilerParams(
            dimension_semantics=("parallel",)),
    )(x_bf, w1_bf, b1.astype(jnp.float32), w2_bf, b2.astype(jnp.float32), w3_p, b3_p)

    # Slice off batch padding and the padded class lanes.
    return out[:B, :C]


def init_params(key, input_features=128, h_features=64, n_classes=4):
    """Deterministic synthetic params; Linear weights stored torch-style (out, in),
    then transposed for the kernel."""
    ks = jax.random.split(key, 6)

    def linear(kw, kb, fan_in, fan_out):
        bound = 1.0 / jnp.sqrt(fan_in)
        w = jax.random.uniform(kw, (fan_out, fan_in), jnp.float32, -bound, bound)
        b = jax.random.uniform(kb, (fan_out,), jnp.float32, -bound, bound)
        return w, b

    w1, b1 = linear(ks[0], ks[1], input_features, h_features)
    w2, b2 = linear(ks[2], ks[3], h_features, h_features)
    w3, b3 = linear(ks[4], ks[5], h_features, n_classes)
    # transpose to (in, out) and reshape biases to (1, out) for the kernel
    return (w1.T, b1.reshape(1, -1),
            w2.T, b2.reshape(1, -1),
            w3.T, b3.reshape(1, -1))


def dcd_reference(x, w1, b1, w2, b2, w3, b3):
    h1 = jnp.maximum(x @ w1 + b1, 0.0)
    h2 = h1 @ w2 + b2
    logits = h2 @ w3 + b3
    return jax.nn.softmax(logits, axis=1)


if __name__ == "__main__":
    key = jax.random.PRNGKey(0)
    k_x, k_p = jax.random.split(key)

    B, IN, H, C = 32, 128, 64, 4
    x = jax.random.normal(k_x, (B, IN), jnp.float32)
    params = init_params(k_p, input_features=IN, h_features=H, n_classes=C)

    out = dcd_forward(x, *params)          # auto tile -> tb=16, grid=(2,)
    out = jax.block_until_ready(out)

    ref = dcd_reference(x, *params)        # f32 reference
    assert out.shape == (B, C)
    # bf16 matmuls + approx reciprocal -> relaxed tolerance vs f32 reference
    assert jnp.allclose(out, ref, atol=2e-2), "mismatch vs pure-JAX reference"
    assert jnp.allclose(jnp.sum(out, axis=1), 1.0, atol=1e-2), "softmax rows must sum to 1"

    print("KERNEL_OK")
</pallas_src>

<mosaic_0001>
module attributes {stable_mosaic.version = 11 : i64} {
  func.func @dcd_kernel(%arg0: i32, %arg1: memref<16x128xbf16, #tpu.memory_space<vmem>>, %arg2: memref<128x64xbf16, #tpu.memory_space<vmem>>, %arg3: memref<1x64xf32, #tpu.memory_space<vmem>>, %arg4: memref<64x64xbf16, #tpu.memory_space<vmem>>, %arg5: memref<1x64xf32, #tpu.memory_space<vmem>>, %arg6: memref<64x128xbf16, #tpu.memory_space<vmem>>, %arg7: memref<1x128xf32, #tpu.memory_space<vmem>>, %arg8: memref<16x128xf32, #tpu.memory_space<vmem>>) attributes {dimension_semantics = [#tpu.dimension_semantics<parallel>], iteration_bounds = array<i64: 2>, scalar_prefetch = 0 : i64, scratch_operands = 0 : i64, tpu.core_type = #tpu.core_type<tc>, window_params = [{transform_indices = @transform_0, window_bounds = array<i64: 16, 128>}, {pipeline_mode = #tpu.pipeline_mode<synchronous>, transform_indices = @transform_1, window_bounds = array<i64: 128, 64>}, {pipeline_mode = #tpu.pipeline_mode<synchronous>, transform_indices = @transform_2, window_bounds = array<i64: 1, 64>}, {pipeline_mode = #tpu.pipeline_mode<synchronous>, transform_indices = @transform_3, window_bounds = array<i64: 64, 64>}, {pipeline_mode = #tpu.pipeline_mode<synchronous>, transform_indices = @transform_4, window_bounds = array<i64: 1, 64>}, {pipeline_mode = #tpu.pipeline_mode<synchronous>, transform_indices = @transform_5, window_bounds = array<i64: 64, 128>}, {pipeline_mode = #tpu.pipeline_mode<synchronous>, transform_indices = @transform_6, window_bounds = array<i64: 1, 128>}, {transform_indices = @transform_7, window_bounds = array<i64: 16, 128>}]} {
    %c0 = arith.constant 0 : index
    %c0_0 = arith.constant 0 : index
    %0 = vector.load %arg1[%c0, %c0_0] : memref<16x128xbf16, #tpu.memory_space<vmem>>, vector<16x128xbf16>
    %c0_1 = arith.constant 0 : index
    %c0_2 = arith.constant 0 : index
    %1 = vector.load %arg2[%c0_1, %c0_2] : memref<128x64xbf16, #tpu.memory_space<vmem>>, vector<128x64xbf16>
    %cst = arith.constant dense<0.000000e+00> : vector<16x64xf32>
    %2 = tpu.matmul %0, %1, %cst {dimension_numbers = #tpu.dot_dimension_numbers<[1], [0], [0], [1], [0, 0, 1, 1], [], []>} : vector<16x128xbf16>, vector<128x64xbf16>, vector<16x64xf32> -> vector<16x64xf32>
    %c0_3 = arith.constant 0 : index
    %c0_4 = arith.constant 0 : index
    %3 = vector.load %arg3[%c0_3, %c0_4] : memref<1x64xf32, #tpu.memory_space<vmem>>, vector<1x64xf32>
    %4 = vector.broadcast %3 : vector<1x64xf32> to vector<16x64xf32>
    %5 = arith.addf %2, %4 : vector<16x64xf32>
    %cst_5 = arith.constant 0.000000e+00 : f32
    %6 = vector.broadcast %cst_5 : f32 to vector<16x64xf32>
    %7 = arith.maximumf %5, %6 : vector<16x64xf32>
    %8 = arith.truncf %7 : vector<16x64xf32> to vector<16x64xbf16>
    %c0_6 = arith.constant 0 : index
    %c0_7 = arith.constant 0 : index
    %9 = vector.load %arg4[%c0_6, %c0_7] : memref<64x64xbf16, #tpu.memory_space<vmem>>, vector<64x64xbf16>
    %cst_8 = arith.constant dense<0.000000e+00> : vector<16x64xf32>
    %10 = tpu.matmul %8, %9, %cst_8 {dimension_numbers = #tpu.dot_dimension_numbers<[1], [0], [0], [1], [0, 0, 1, 1], [], []>} : vector<16x64xbf16>, vector<64x64xbf16>, vector<16x64xf32> -> vector<16x64xf32>
    %c0_9 = arith.constant 0 : index
    %c0_10 = arith.constant 0 : index
    %11 = vector.load %arg5[%c0_9, %c0_10] : memref<1x64xf32, #tpu.memory_space<vmem>>, vector<1x64xf32>
    %12 = vector.broadcast %11 : vector<1x64xf32> to vector<16x64xf32>
    %13 = arith.addf %10, %12 : vector<16x64xf32>
    %14 = arith.truncf %13 : vector<16x64xf32> to vector<16x64xbf16>
    %c0_11 = arith.constant 0 : index
    %c0_12 = arith.constant 0 : index
    %15 = vector.load %arg6[%c0_11, %c0_12] : memref<64x128xbf16, #tpu.memory_space<vmem>>, vector<64x128xbf16>
    %cst_13 = arith.constant dense<0.000000e+00> : vector<16x128xf32>
    %16 = tpu.matmul %14, %15, %cst_13 {dimension_numbers = #tpu.dot_dimension_numbers<[1], [0], [0], [1], [0, 0, 1, 1], [], []>} : vector<16x64xbf16>, vector<64x128xbf16>, vector<16x128xf32> -> vector<16x128xf32>
    %c0_14 = arith.constant 0 : index
    %c0_15 = arith.constant 0 : index
    %17 = vector.load %arg7[%c0_14, %c0_15] : memref<1x128xf32, #tpu.memory_space<vmem>>, vector<1x128xf32>
    %18 = vector.broadcast %17 : vector<1x128xf32> to vector<16x128xf32>
    %19 = arith.addf %16, %18 : vector<16x128xf32>
    %cst_16 = arith.constant dense<0xFF800000> : vector<16xf32>
    %20 = vector.multi_reduction <maximumf>, %19, %cst_16 [1] : vector<16x128xf32> to vector<16xf32>
    %21 = vector.shape_cast %20 : vector<16xf32> to vector<16x1xf32>
    %22 = vector.broadcast %21 : vector<16x1xf32> to vector<16x128xf32>
    %23 = arith.subf %19, %22 : vector<16x128xf32>
    %24 = math.exp %23 : vector<16x128xf32>
    %cst_17 = arith.constant dense<0.000000e+00> : vector<16xf32>
    %25 = vector.multi_reduction <add>, %24, %cst_17 [1] : vector<16x128xf32> to vector<16xf32>
    %26 = vector.shape_cast %25 : vector<16xf32> to vector<16x1xf32>
    %27 = tpu.reciprocal %26 {approx = true} : vector<16x1xf32> -> vector<16x1xf32>
    %28 = vector.broadcast %27 : vector<16x1xf32> to vector<16x128xf32>
    %29 = arith.mulf %24, %28 : vector<16x128xf32>
    %c0_18 = arith.constant 0 : index
    %c0_19 = arith.constant 0 : index
    %30 = vector.load %arg8[%c0_18, %c0_19] : memref<16x128xf32, #tpu.memory_space<vmem>>, vector<16x128xf32>
    tpu.vector_store %arg8[%c0_18, %c0_19], %29 {strides = array<i32>} : memref<16x128xf32, #tpu.memory_space<vmem>>, vector<16x128xf32>,
    return
  }
  func.func @transform_0(%arg0: i32) -> (i32, i32) {
    %c0_i32 = arith.constant 0 : i32
    %c0_i32_0 = arith.constant 0 : i32
    return %arg0, %c0_i32 : i32, i32
  }
  func.func @transform_1(%arg0: i32) -> (i32, i32) {
    %c0_i32 = arith.constant 0 : i32
    %c0_i32_0 = arith.constant 0 : i32
    %c0_i32_1 = arith.constant 0 : i32
    return %c0_i32, %c0_i32_0 : i32, i32
  }
  func.func @transform_2(%arg0: i32) -> (i32, i32) {
    %c0_i32 = arith.constant 0 : i32
    %c0_i32_0 = arith.constant 0 : i32
    %c0_i32_1 = arith.constant 0 : i32
    return %c0_i32, %c0_i32_0 : i32, i32
  }
  func.func @transform_3(%arg0: i32) -> (i32, i32) {
    %c0_i32 = arith.constant 0 : i32
    %c0_i32_0 = arith.constant 0 : i32
    %c0_i32_1 = arith.constant 0 : i32
    return %c0_i32, %c0_i32_0 : i32, i32
  }
  func.func @transform_4(%arg0: i32) -> (i32, i32) {
    %c0_i32 = arith.constant 0 : i32
    %c0_i32_0 = arith.constant 0 : i32
    %c0_i32_1 = arith.constant 0 : i32
    return %c0_i32, %c0_i32_0 : i32, i32
  }
  func.func @transform_5(%arg0: i32) -> (i32, i32) {
    %c0_i32 = arith.constant 0 : i32
    %c0_i32_0 = arith.constant 0 : i32
    %c0_i32_1 = arith.constant 0 : i32
    return %c0_i32, %c0_i32_0 : i32, i32
  }
  func.func @transform_6(%arg0: i32) -> (i32, i32) {
    %c0_i32 = arith.constant 0 : i32
    %c0_i32_0 = arith.constant 0 : i32
    %c0_i32_1 = arith.constant 0 : i32
    return %c0_i32, %c0_i32_0 : i32, i32
  }
  func.func @transform_7(%arg0: i32) -> (i32, i32) {
    %c0_i32 = arith.constant 0 : i32
    %c0_i32_0 = arith.constant 0 : i32
    return %arg0, %c0_i32 : i32, i32
  }
}

</mosaic_0001>

<bundles_post_ra>
// kernel: tpu_custom_call.1
= control target key start
LH: loop header
LB: loop body
LE: loop exit
PB: predicated region body
PF: predicated region fallthrough
CT: control target
= control target key end

     0   :  { %12 = vsyncpa [#allocation3], 0  ;;  %s1126_s0 = inlined_call_operand.vmem [shape: bf16[32,128], index: 0, kind: input, shape index: {}]   ;;  %s1127_s1 = inlined_call_operand.vmem [shape: bf16[128,64], index: 1, kind: input, shape index: {}]   ;;  %s1128_s2 = inlined_call_operand.vmem [shape: f32[1,64], index: 2, kind: input, shape index: {}]   ;;  %s1129_s3 = inlined_call_operand.vmem [shape: bf16[64,64], index: 3, kind: input, shape index: {}]   ;;  %s1130_s4 = inlined_call_operand.vmem [shape: f32[1,64], index: 4, kind: input, shape index: {}]   ;;  %s1131_s5 = inlined_call_operand.vmem [shape: bf16[64,128], index: 5, kind: input, shape index: {}]   ;;  %s1132_s6 = inlined_call_operand.vmem [shape: f32[1,128], index: 6, kind: input, shape index: {}]   ;;  %s1133_s7 = inlined_call_operand.hbm [shape: f32[32,128], index: 7, kind: output, shape index: {}]  }
   0x1   :  { %14 = vsyncpa [#allocation3 + $0x1], 0  ;;  %s943_s24 = smov 0   ;;  %s945_s25 = smov 0  }
   0x2   :  { %s947_s26 = smov 0   ;;  %s949_s27 = smov 0  }
   0x3 LB: > { %s964_s28 = sadd.s32 4294967295, %s896_s27   ;;  %s668_s29 = sadd.s32 4294967294, %s896_s27   ;;  %s896_s27 = sphi %s949_s27, %s1139_s27   ;;  %s892_s26 = sphi %s947_s26, %s1138_s26   ;;  %s888_s25 = sphi %s945_s25, %s1137_s25   ;;  %s884_s24 = sphi %s943_s24, %s1136_s24  }
   0x4   : > { %s968_s30 = sadd.s32 1, %s896_s27   ;;  %s179_s8 = sadd.s32 1, %s892_s26 }
   0x5   : > { %s176_s9 = ssub.s32 %s896_s27, %s968_s30  ;;  %p189_p0 = scmp.ne.s32.totalorder %s892_s26, %s888_s25 }
   0x6   : > { %p177_p1 = scmp.eq.s32.totalorder %s176_s9, 0  ;;  %p190_p2 = scmp.eq.s32.totalorder %s964_s28, 1 }
   0x7   : > { %p195_p3 = scmp.ne.s32.totalorder %s888_s25, %s884_s24  ;;  %p196_p4 = scmp.eq.s32.totalorder %s668_s29, 1 }
   0x8   : > { %s979_s10 = scalar_select %p177_p1, %s892_s26, %s179_s8  }
   0x9   : > { %p981_p5 = por %p190_p2, %p189_p0  ;;  %p985_p6 = por %p196_p4, %p195_p3 }
   0xa   : > { %p671_p7 = scmp.ge.s32.totalorder %s896_s27, 1  ;;  %p241_p8 = scmp.lt.s32.totalorder %s896_s27, 3 }
   0xc   : > { %p242_p9 = pnand %p671_p7, %p241_p8 }
   0xd   : > { %v809_v0 = vld [vmem:[%s1127_s1] sm:$0xff] (!%p242_p9)   ;;  %v898_v1 = vmov (!%p242_p9), 0.0   ;;  %v810_v2 = vld [vmem:[%s1127_s1 + $0x8] sm:$0xff] (!%p242_p9)   ;;  %vm899_vm0 = vmmov (!%p242_p9), 0   ;;  %s673_s17 = sshll.u32 (!%p242_p9), %s964_s28, 1  ;;  %v811_v3 = vld [vmem:[%s1127_s1 + $0x10] sm:$0xff] (!%p242_p9)  }
   0xe   : > { %245 = sbr.rel (%p242_p9) target bundleno = 1029 (0x405), region = 48  ;;  %722 = vmatprep.subr.bf16.mxu0 (!%p242_p9), %v898_v1  ;;  %742 = vmatprep.subr.bf16.mxu1 (!%p242_p9), %v898_v1  ;;  %p274_p10 = scmp.lt.s32.totalorder (!%p242_p9), %s673_s17, 3  ;;  %v818_v4 = vld [vmem:[%s1129_s3] sm:$0xff] (!%p242_p9)   ;;  %v812_v5 = vld [vmem:[%s1127_s1 + $0x18] sm:$0xff] (!%p242_p9)   ;;  %v819_v6 = vld [vmem:[%s1129_s3 + $0x8] sm:$0xff] (!%p242_p9)   ;;  %vm443_vm1 = vcmask (!%p242_p9), 523264  }
   0xf   : > { %723 = vmatpush3.bf16.msra.mxu0 (!%p242_p9), %v809_v0  ;;  %738 = vmatprep.mubr.msk.bf16.mxu0 (!%p242_p9), %vm899_vm0, %v898_v1  ;;  %v813_v7 = vld [vmem:[%s1127_s1 + $0x20] sm:$0xff] (!%p242_p9)   ;;  %v814_v8 = vld [vmem:[%s1127_s1 + $0x28] sm:$0xff] (!%p242_p9)   ;;  %v815_v9 = vld [vmem:[%s1127_s1 + $0x30] sm:$0xff] (!%p242_p9)   ;;  %s270_s15 = sand.u32 (!%p242_p9), 1, %s888_s25  }
  0x10   : > { %724 = vmatprep.subr.bf16.mxu0 (!%p242_p9), %v898_v1  ;;  %750 = vmatprep.mubr.msk.bf16.mxu1 (!%p242_p9), %vm899_vm0, %v898_v1  ;;  %v816_v10 = vld [vmem:[%s1127_s1 + $0x38] sm:$0xff] (!%p242_p9)   ;;  %v820_v12 = vld [vmem:[%s1129_s3 + $0x10] sm:$0xff] (!%p242_p9)   ;;  %v675_v14 = vld [vmem:[%s1128_s2] ss:$0 sm:$0xff] (!%p242_p9)  ;;  %s672_s16 = sshll.u32 (!%p242_p9), %s270_s15, 4  ;;  %s1085_s22 = scalar_lea.sflag (!%p242_p9), [#allocation3], %s270_s15 }
  0x11   : > { %743 = vmatpush3.bf16.msra.mxu1 (!%p242_p9), %v818_v4  ;;  %v821_v13 = vld [vmem:[%s1129_s3 + $0x18] sm:$0xff] (!%p242_p9)   ;;  %v822_v23 = vld [vmem:[%s1131_s5] sm:$0xff] (!%p242_p9)   ;;  %v823_v25 = vld [vmem:[%s1131_s5 + $0x8] sm:$0xff] (!%p242_p9)  }
  0x12   : > { %744 = vmatprep.subr.bf16.mxu1 (!%p242_p9), %v898_v1  ;;  %v824_v26 = vld [vmem:[%s1131_s5 + $0x10] sm:$0xff] (!%p242_p9)   ;;  %v825_v27 = vld [vmem:[%s1131_s5 + $0x18] sm:$0xff] (!%p242_p9)   ;;  %v685_v28 = vld [vmem:[%s1130_s4] ss:$0 sm:$0xff] (!%p242_p9) }
  0x13   : > { %725 = vmatpush3.bf16.msra.mxu0 (!%p242_p9), %v810_v2  ;;  %v691_v36 = vld [vmem:[%s1132_s6] ss:$0 sm:$0xff] (!%p242_p9) }
  0x14   : > { %726 = vmatprep.subr.bf16.mxu0 (!%p242_p9), %v898_v1 }
  0x15   : > { %s1141_s17 = smov (!%p274_p10, %s673_s17), 3  ;;  %745 = vmatpush3.bf16.msra.mxu1 %v819_v6 }
  0x16   : > { %s674_s20 = sshll.u32 %s1141_s17, 2  ;;  %746 = vmatprep.subr.bf16.mxu1 %v898_v1  ;;  %s272_s17 = scalar_lea.vmem [#allocation2], %s672_s16 }
  0x17   : > { %s277_s23 = scalar_lea.vmem %s1126_s0, %s674_s20  ;;  %727 = vmatpush3.bf16.msra.mxu0 %v811_v3  ;;  %s606_s18 = sshll.u32 %s272_s17, 4  ;;  %s1083_s18 = int_to_ptr.vmem [resolvable:$true] %s606_s18 }
  0x18   : > { %728 = vmatprep.subr.bf16.mxu0 %v898_v1  ;;  %v817_v11 = vld [vmem:[%s277_s23] sm:$0xff]   ;;  %s702_s23 = sshll.u32 %s964_s28, 8  ;;  %s834_s29 = scalar_lea.vmem %s1083_s18, 256 }
  0x19   : > { %747 = vmatpush3.bf16.msra.mxu1 %v820_v12  ;;  %s1081_s21 = scalar_lea.hbm %s1133_s7, %s702_s23  ;;  %p835_p11 = scmp.ne.s32.totalorder %s1083_s18, %s834_s29 }
  0x1a   : > { %748 = vmatprep.subr.bf16.mxu1 %v898_v1  ;;  %s900_s28 = smov [#allocation2]  }
  0x1b   : > { %729 = vmatpush3.bf16.msra.mxu0 %v812_v5  ;;  %p836_p12 = pnand %p835_p11, %p981_p5  ;;  %s838_s8 = sshll.u32 %s900_s28, 4  ;;  %s839_s8 = int_to_ptr.vmem [resolvable:$false] %s838_s8 }
  0x1c   : > { %730 = vmatprep.subr.bf16.mxu0 %v898_v1  ;;  %s840_s9 = scalar_lea.vmem %s839_s8, 512  ;;  %p841_p0 = scmp.lt.s32.totalorder %s1083_s18, %s839_s8 }
  0x1d   : > { %749 = vmatpush3.bf16.msra.mxu1 %v821_v13  ;;  %p837_p13 = pneg %p836_p12  ;;  %p842_p1 = scmp.lt.s32.totalorder %s840_s9, %s834_s29 }
  0x1e   : > { %754 = vmatprep.subr.bf16.mxu1 %v898_v1 }
  0x1f   : > { %731 = vmatpush3.bf16.msra.mxu0 %v813_v7  ;;  %p843_p2 = por %p842_p1, %p841_p0 }
  0x20   : > { %732 = vmatprep.subr.bf16.mxu0 %v898_v1 }
  0x21   : > { %p844_p3 = pnand %p843_p2, %p837_p13 }
  0x23   : > { %733 = vmatpush3.bf16.msra.mxu0 %v814_v8 }
  0x24   : > { %734 = vmatprep.subr.bf16.mxu0 %v898_v1 }
  0x27   : > { %735 = vmatpush3.bf16.msra.mxu0 %v815_v9 }
  0x28   : > { %736 = vmatprep.subr.bf16.mxu0 %v898_v1 }
  0x2b   : > { %737 = vmatpush3.bf16.msra.mxu0 %v816_v10 }
  0x2e   : > { %739 = vmatmul.mubr.bf16.vlgmr.msra.gmra.mrb[0].mxu0 %v817_v11 }
 0x101   : > { %v394_v15 = vpop.f32.mrb[0].mxu0 }
 0x102   : > { %v395_v16 = vadd.f32 %v675_v14, %v394_v15  ;;  %v740_v17 = vpop.f32.mrb[1].mxu0 }
 0x103   : > { %v397_v18 = vpop.f32.mrb[2].mxu0 }
 0x104   : > { %v398_v19 = vadd.f32 %v675_v14, %v397_v18  ;;  %v741_v20 = vpop.f32.mrb[3].mxu0  ;;  %v401_v21 = vmax.f32 %v395_v16, 0.0 }
 0x106   : > { %v402_v22 = vmax.f32 %v398_v19, 0.0 }
 0x108   : > { %v403_v24 = vpack.c.bf16 %v402_v22, %v401_v21 }
 0x10a   : > { %751 = vmatmul.mubr.msk.bf16.vlgmr.msra.gmra.mrb[0].mxu1 %vm443_vm1, %v403_v24 }
 0x10b   : > { %755 = vmatpush3.bf16.msra.mxu1 %v822_v23  ;;  %762 = vmatprep.mubr.msk.bf16.mxu1 %vm899_vm0, %v898_v1 }
 0x10c   : > { %756 = vmatprep.subr.bf16.mxu1 %v898_v1 }
 0x10f   : > { %757 = vmatpush3.bf16.msra.mxu1 %v823_v25 }
 0x110   : > { %758 = vmatprep.subr.bf16.mxu1 %v898_v1 }
 0x113   : > { %759 = vmatpush3.bf16.msra.mxu1 %v824_v26 }
 0x114   : > { %760 = vmatprep.subr.bf16.mxu1 %v898_v1 }
 0x117   : > { %761 = vmatpush3.bf16.msra.mxu1 %v825_v27 }
 0x1dd   : > { %v481_v29 = vpop.f32.mrb[0].mxu1 }
 0x1de   : > { %v752_v30 = vpop.f32.mrb[1].mxu1  ;;  %v482_v32 = vadd.f32 %v685_v28, %v481_v29 }
 0x1df   : > { %v484_v31 = vpop.f32.mrb[2].mxu1 }
 0x1e0   : > { %v485_v33 = vadd.f32 %v685_v28, %v484_v31  ;;  %v753_v34 = vpop.f32.mrb[3].mxu1 }
 0x1e2   : > { %v488_v35 = vpack.c.bf16 %v485_v33, %v482_v32 }
 0x1e4   : > { %763 = vmatmul.mubr.msk.bf16.vlgmr.msra.gmra.mrb[4].mxu1 %vm443_vm1, %v488_v35 }
 0x2b7   : > { %v565_v37 = vpop.f32.mrb[4].mxu1 }
 0x2b8   : > { %v566_v38 = vadd.f32 %v691_v36, %v565_v37  ;;  %v764_v39 = vpop.f32.mrb[5].mxu1 }
 0x2b9   : > { %v568_v40 = vpop.f32.mrb[6].mxu1 }
 0x2ba   : > { %572 = vmax.xlane.f32.xlu0 %v566_v38  ;;  %v765_v41 = vpop.f32.mrb[7].mxu1  ;;  %v569_v42 = vadd.f32 %v691_v36, %v568_v40 }
 0x2be   : > { %574 = vmax.xlane.f32.xlu0 %v569_v42 }
 0x347   : > { %v573_v43 = vpop.xlane.xlu0 %572 }
 0x348   : > { %v576_v44 = vsub.f32 %v566_v38, %v573_v43 }
 0x34a   : > { %v578_v45 = vmul.f32 1.442695, %v576_v44 }
 0x34b   : > { %v575_v46 = vpop.xlane.xlu0 %574 }
 0x34c   : > { %826 = vpow2.f32 %v578_v45  ;;  %v577_v47 = vsub.f32 %v569_v42, %v575_v46 }
 0x34e   : > { %v580_v48 = vmul.f32 1.442695, %v577_v47 }
 0x350   : > { %828 = vpow2.f32 %v580_v48 }
 0x356   : > { %v827_v49 = vpop.eup %826 }
 0x357   : > { %582 = vadd.xlane.f32.xlu1 %v827_v49 }
 0x35a   : > { %v829_v50 = vpop.eup %828 }
 0x35b   : > { %584 = vadd.xlane.f32.xlu1 %v829_v50 }
 0x3e4   : > { %v583_v51 = vpop.xlane.xlu1 %582 }
 0x3e5   : > { %830 = vrcp.f32 %v583_v51 }
 0x3e8   : > { %v585_v52 = vpop.xlane.xlu1 %584 }
 0x3e9   : > { %832 = vrcp.f32 %v585_v52 }
 0x3ef   : > { %v831_v53 = vpop.eup %830 }
 0x3f0   : > { %v588_v54 = vmul.f32 %v831_v53, %v827_v49 }
 0x3f2   : > { %590 = vst [vmem:[%s272_s17] sm:$0xff] %v588_v54 }
 0x3f3   : > { %v833_v55 = vpop.eup %832 }
 0x3f4   : > { %v589_v56 = vmul.f32 %v833_v55, %v829_v50 }
 0x3f6   : > { %591 = vst [vmem:[%s272_s17 + $0x8] sm:$0xff] %v589_v56 }
 0x3f7   : > { %847 = shalt.err (!%p844_p3)
}
 0x3f8   : > { %s848_s13 = scalar_lea.hbm %s1081_s21, 256  ;;  %s852_s16 = scalar_lea.hbm %s1133_s7, 512 }
 0x3f9   : > { %p849_p4 = scmp.ne.s32.totalorder %s1081_s21, %s848_s13  ;;  %p853_p9 = scmp.lt.u32.totalorder %s1081_s21, %s1133_s7 }
 0x3fa   : > { %p854_p10 = scmp.lt.u32.totalorder %s852_s16, %s848_s13  ;;  %p856_p12 = scmp.lt.u32.totalorder %s848_s13, %s1081_s21 }
 0x3fb   : > { %p850_p7 = pnand %p849_p4, %p981_p5 }
 0x3fc   : > { %p855_p11 = por %p854_p10, %p853_p9 }
 0x3fd   : > { %p851_p8 = pneg %p850_p7 }
 0x3fe   : > { %p857_p13 = por %p856_p12, %p855_p11 }
 0x400   : > { %p858_p0 = pnand %p857_p13, %p851_p8 }
 0x402   : > { %861 = shalt.err (!%p858_p0)
}
 0x403   : > { %s901_s19 = smov 128   ;;  %s902_s20 = smov 8  }
 0x404   : > { %766 = dma.vmem_to_hbm [thread:$0]  (%p981_p5), %s1083_s18, 256, %s1081_s21, %s1085_s22, %s901_s19, %s901_s19, %s902_s20  }
 0x405 PF: > { %p772_p1 = scmp.ge.s32.totalorder %s896_s27, 2  ;;  %s621_s29 = sand.u32 1, %s884_s24  }
 0x406   : > { %s622_s28 = scalar_lea.sflag [#allocation3], %s621_s29 }
 0x407   : > { %p769_p2 = pnand %p772_p1, %p985_p6 }
 0x409   : > { %879 = dma.done.wait (!%p769_p2), %s622_s28, 256  }
 0x40a   : > { %881 = vsyncadd (!%p769_p2), %s622_s28, 4294967040  ;;  %p17_p3 = scmp.ge.s32.totalorder %s968_s30, 4   ;;  %s1136_s24 = smov %s888_s25 }
 0x40b   : > { %s1137_s25 = smov %s892_s26  ;;  %s1138_s26 = smov %s979_s10 }
 0x40c   : > { %s1139_s27 = smov %s968_s30  ;;  %19 = sbr.rel (!%p17_p3) target bundleno = 3 (0x3), region = 83 }
 0x413   :  { %627 = vsyncpa [#allocation3], 1 }
 0x414   :  { %629 = vsyncpa [#allocation3 + $0x1], 1 }

</bundles_post_ra>
